<compile_context>
chip_gen: v6e
topology: v6e:2x2x1
jax: 0.10.0
libtpu: 0.0.40
codegen_flags: <defaults>
</compile_context>

<pallas_src>
import math
import functools

import jax
import jax.numpy as jnp
from jax import lax
from jax.experimental import pallas as pl
from jax.experimental.pallas import tpu as pltpu

EPS = 1e-7
TANH_CLAMP = 1.0 - 1e-5
LANES = 128


def _round_up(x, m):
    return ((x + m - 1) // m) * m


def _cdiv(a, b):
    return (a + b - 1) // b


def _artanh(x):
    x = jnp.clip(x, -TANH_CLAMP, TANH_CLAMP)
    return 0.5 * jnp.log((1.0 + x) / (1.0 - x))


def _num_tensorcores():
    """Best-effort TensorCore count (guarded; defaults to 2 = megacore-safe)."""
    try:
        info = pltpu.get_tpu_info()
        for name in ("num_tensorcores", "tensorcore_count", "num_cores",
                     "core_count"):
            v = getattr(info, name, None)
            if isinstance(v, int) and v > 0:
                return v
    except Exception:
        pass
    return 2


# ----------------------------------------------------------------------------
# Host-side parameter glue: fold the butterfly block structure AND the
# first/second-half sign mask into per-layer, per-lane coefficient rows so the
# kernel layer is    out = A*x + Bp*x[i+bs] + Bm*x[i-bs]
# which reproduces   y1 = a*x1 + b*x2 ;  y2 = -b*x1 + a*x2.
# Rows are tiled G times so G logical rows share one 128-lane vreg row.
# ----------------------------------------------------------------------------
def butterfly_coeff_rows(params, dim, L, G):
    log2_d = int(math.log2(dim))
    a_rows, bp_rows, bm_rows = [], [], []
    offset = 0
    for l in range(L):
        bs = 1 << (l % log2_d)
        nb = dim // (2 * bs)
        p = params[offset:offset + 2 * nb].reshape(nb, 2)
        offset += 2 * nb
        a, b = p[:, 0], p[:, 1]
        zeros = jnp.zeros((nb, bs), params.dtype)
        a_dim = jnp.repeat(a, 2 * bs)                                   # (dim,)
        bp_dim = jnp.concatenate(
            [jnp.broadcast_to(b[:, None], (nb, bs)), zeros], axis=1).reshape(dim)
        bm_dim = jnp.concatenate(
            [zeros, jnp.broadcast_to(-b[:, None], (nb, bs))], axis=1).reshape(dim)
        a_rows.append(jnp.tile(a_dim, G))
        bp_rows.append(jnp.tile(bp_dim, G))
        bm_rows.append(jnp.tile(bm_dim, G))
    return (jnp.stack(a_rows).astype(jnp.float32),
            jnp.stack(bp_rows).astype(jnp.float32),
            jnp.stack(bm_rows).astype(jnp.float32))


# ----------------------------------------------------------------------------
# Pallas kernel: one packed batch tile (tile_rows, W) per grid step,
# W = G * dim (lane-dense; W == 128 whenever dim < 128).
# ----------------------------------------------------------------------------
def _geodesic_butterfly_kernel(*refs, c, t, L, log2_d, W, use_mxu):
    if use_mxu:
        x_ref, a_ref, bp_ref, bm_ref, seg_ref, z_ref, nan_ref = refs
    else:
        x_ref, a_ref, bp_ref, bm_ref, z_ref, nan_ref = refs
        seg_ref = None

    h = x_ref[...]                                  # (TB, W) f32

    one = jnp.float32(1.0)
    two = jnp.float32(2.0)
    half = jnp.float32(0.5)
    eps = jnp.float32(EPS)
    clamp = jnp.float32(TANH_CLAMP)
    c_f = jnp.float32(c)
    c_eps2 = jnp.float32(c * EPS * EPS)

    def recip(x):
        # approximate reciprocal on the EUP + one Newton step (~f32 exact);
        # only used for the mobius_add denominator.
        r = pl.reciprocal(x, approx=True)
        return r * (two - x * r)

    if use_mxu:
        seg2 = seg_ref[...]                         # (2W, W) bf16 [seg; seg]

        def seg_sum(v):
            # per-logical-row (per dim-wide lane segment) sum, broadcast back
            # over the segment; hi/lo bf16 split keeps ~f32 accuracy.  The two
            # partial matmuls are fused along K (single K=2W dot, f32 acc).
            hi = v.astype(jnp.bfloat16)
            lo = (v - hi.astype(jnp.float32)).astype(jnp.bfloat16)
            stacked = jnp.concatenate([hi, lo], axis=-1)        # (TB, 2W)
            return jnp.dot(stacked, seg2, preferred_element_type=jnp.float32)
    else:
        def seg_sum(v):
            # G == 1: one segment per row -> plain XLU lane reduce (the XLU is
            # nearly idle in this kernel), broadcast via (TB, 1) keepdims.
            return jnp.sum(v, axis=-1, keepdims=True)

    def artanh(x):
        x = jnp.clip(x, -clamp, clamp)
        return half * (jnp.log(one + x) - jnp.log(one - x))

    # ---- log map at origin: u = artanh(sqrt(c)||h||)/(sqrt(c)||h||) * h ----
    hsq = seg_sum(h * h)                              # reused by both mobius_add
    chsq = jnp.maximum(c_f * hsq, c_eps2)             # (sqrt_c * max(||h||,eps))^2
    inv_h = lax.rsqrt(chsq)                           # 1 / (sqrt_c * hn)
    schn = chsq * inv_h                               # sqrt_c * hn
    u = artanh(schn) * inv_h * h

    # ---- butterfly transform (L static layers, mask-free formulation) ----
    out = u
    for l in range(L):
        bs = 1 << (l % log2_d)
        a_l = a_ref[l, :].reshape(1, W)
        bp_l = bp_ref[l, :].reshape(1, W)
        bm_l = bm_ref[l, :].reshape(1, W)
        out = (a_l * out
               + bp_l * pltpu.roll(out, W - bs, axis=1)   # partner x[i + bs]
               + bm_l * pltpu.roll(out, bs, axis=1))      # partner x[i - bs]

    # ---- exp map at origin: v -> tanh(sqrt(c)||v||)/(sqrt(c)||v||) * v ----
    vsq = seg_sum(out * out)
    cvsq = jnp.maximum(c_f * vsq, c_eps2)
    inv_v = lax.rsqrt(cvsq)
    scvn = cvsq * inv_v                               # sqrt_c * vn
    scale_exp = jnp.tanh(scvn) * inv_v
    u_hyp = scale_exp * out
    uh_sq = scale_exp * scale_exp * vsq               # ||u_hyp||^2 (scaling identity)

    # ---- geodesic(h, u_hyp, c, t) via Mobius operations ----
    def mobius_add(x, y, x2, y2):
        xy = seg_sum(x * y)
        num = (one + two * c_f * xy + c_f * y2) * x + (one - c_f * x2) * y
        den = one + two * c_f * xy + (c_f * c_f) * x2 * y2
        return num * recip(jnp.maximum(den, eps))

    def mobius_scalar(r, x, xsq):
        cxsq = jnp.maximum(c_f * xsq, c_eps2)
        inv = lax.rsqrt(cxsq)
        scn = cxsq * inv                              # sqrt_c * xn  (artanh clips)
        factor = jnp.tanh(r * artanh(scn)) * inv
        return factor * x, factor * factor * xsq      # result, ||result||^2

    w = mobius_add(-h, u_hyp, hsq, uh_sq)             # ||-h||^2 == ||h||^2
    wsq = seg_sum(w * w)
    ms, ms_sq = mobius_scalar(jnp.float32(t), w, wsq)
    z = mobius_add(h, ms, hsq, ms_sq)

    z_ref[...] = z

    # per-grid-step NaN flag: scalar max, broadcast into one lane-dense
    # (8, 128) tile (unmasked vst, negligible writeback).
    nanf = jnp.isnan(z).astype(jnp.float32)
    flag = jnp.max(jnp.max(nanf, axis=-1, keepdims=True), axis=-2, keepdims=True)
    nan_ref[...] = jnp.broadcast_to(flag, nan_ref.shape)


# ----------------------------------------------------------------------------
# Wrapper: lane packing, tiling, NaN fallback glue.
# ----------------------------------------------------------------------------
def geodesic_butterfly_layer(h, params, *, c, L, t, max_tile_rows=1024):
    batch, dim = h.shape
    log2_d = int(math.log2(dim))
    assert dim == (1 << log2_d), "dim must be a power of two"

    # lane packing factor: G logical rows side by side fill the 128 lanes
    G = LANES // dim if (dim < LANES and LANES % dim == 0) else 1
    W = G * dim
    use_mxu = G > 1

    h32 = h.astype(jnp.float32)

    # pad batch to a multiple of G and pack rows into (packed, W)
    pad_b = (-batch) % G
    hp = (jnp.concatenate([h32, jnp.zeros((pad_b, dim), jnp.float32)], axis=0)
          if pad_b else h32)
    packed = (batch + pad_b) // G
    hp = hp.reshape(packed, W)

    # Tile over packed rows: big tiles amortize per-step overhead (cap keeps
    # v7x's 64 MiB VMEM comfortable); on multi-TensorCore parts make the tile
    # count a multiple of the core count so the "parallel" grid axis balances.
    n_cores = _num_tensorcores()
    tile_rows = min(max_tile_rows, _round_up(packed, 8))
    n_tiles = _cdiv(packed, tile_rows)
    if n_cores > 1 and packed > 8 and n_tiles % n_cores != 0:
        target = _round_up(n_tiles, n_cores)
        tile_rows = _round_up(_cdiv(packed, target), 8)
        n_tiles = _cdiv(packed, tile_rows)
    padded = n_tiles * tile_rows
    if padded != packed:
        hp = jnp.concatenate(
            [hp, jnp.zeros((padded - packed, W), jnp.float32)], axis=0)

    a_rows, bp_rows, bm_rows = butterfly_coeff_rows(params, dim, L, G)

    operands = [hp, a_rows, bp_rows, bm_rows]
    in_specs = [
        pl.BlockSpec((tile_rows, W), lambda i: (i, 0)),
        pl.BlockSpec((L, W), lambda i: (0, 0)),
        pl.BlockSpec((L, W), lambda i: (0, 0)),
        pl.BlockSpec((L, W), lambda i: (0, 0)),
    ]
    if use_mxu:
        # [seg; seg] stacked along K for the fused hi/lo segmented-sum matmul.
        lane = jnp.arange(W)
        seg = (lane[:, None] // dim == lane[None, :] // dim)
        seg2 = jnp.concatenate([seg, seg], axis=0).astype(jnp.bfloat16)  # (2W, W)
        operands.append(seg2)
        in_specs.append(pl.BlockSpec((2 * W, W), lambda i: (0, 0)))

    kernel = functools.partial(_geodesic_butterfly_kernel,
                               c=float(c), t=float(t), L=int(L),
                               log2_d=log2_d, W=W, use_mxu=use_mxu)

    z_p, nan_flags = pl.pallas_call(
        kernel,
        out_shape=(jax.ShapeDtypeStruct((padded, W), jnp.float32),
                   jax.ShapeDtypeStruct((n_tiles * 8, LANES), jnp.float32)),
        grid_spec=pltpu.PrefetchScalarGridSpec(
            num_scalar_prefetch=0,
            grid=(n_tiles,),
            in_specs=in_specs,
            out_specs=[
                pl.BlockSpec((tile_rows, W), lambda i: (i, 0)),
                pl.BlockSpec((8, LANES), lambda i: (i, 0)),
            ],
        ),
        compiler_params=pltpu.CompilerParams(
            dimension_semantics=("parallel",)),
    )(*operands)

    z = z_p.reshape(padded * G, dim)[:batch]

    # PyTorch: if torch.isnan(z).any(): z = relu(h)
    # lax.cond keeps the no-NaN fast path free of an extra relu+select pass.
    any_nan = jnp.max(nan_flags) > 0.0
    result = lax.cond(any_nan,
                      lambda ops: jax.nn.relu(ops[0]),
                      lambda ops: ops[1],
                      (h32, z))
    return result.astype(h.dtype)


# ----------------------------------------------------------------------------
# Pure-JAX reference (mirrors the PyTorch code path, reshape-based butterfly)
# ----------------------------------------------------------------------------
def reference(h, params, *, c, L, t):
    batch, dim = h.shape
    log2_d = int(math.log2(dim))
    sqrt_c = math.sqrt(c)

    def safe_norm(v):
        return jnp.maximum(jnp.sqrt(jnp.sum(v * v, axis=-1, keepdims=True)), EPS)

    hn = safe_norm(h)
    u = _artanh(sqrt_c * hn) / (sqrt_c * hn) * h

    out = u
    offset = 0
    for l in range(L):
        bs = 1 << (l % log2_d)
        nb = dim // (2 * bs)
        p = params[offset:offset + 2 * nb].reshape(nb, 2)
        offset += 2 * nb
        o = out.reshape(batch, nb, 2, bs)
        a = p[:, 0].reshape(1, nb, 1)
        b = p[:, 1].reshape(1, nb, 1)
        x1, x2 = o[:, :, 0, :], o[:, :, 1, :]
        y1 = a * x1 + b * x2
        y2 = -b * x1 + a * x2
        out = jnp.stack([y1, y2], axis=2).reshape(batch, dim)

    vn = safe_norm(out)
    u_hyp = jnp.tanh(sqrt_c * vn) / (sqrt_c * vn) * out

    def mobius_add(x, y):
        x2 = jnp.sum(x * x, axis=-1, keepdims=True)
        y2 = jnp.sum(y * y, axis=-1, keepdims=True)
        xy = jnp.sum(x * y, axis=-1, keepdims=True)
        num = (1.0 + 2.0 * c * xy + c * y2) * x + (1.0 - c * x2) * y
        den = 1.0 + 2.0 * c * xy + (c * c) * x2 * y2
        return num / jnp.maximum(den, EPS)

    def mobius_scalar(r, x):
        xn = safe_norm(x)
        scn = jnp.minimum(sqrt_c * xn, TANH_CLAMP)
        return jnp.tanh(r * _artanh(scn)) * x / (sqrt_c * xn)

    z = mobius_add(h, mobius_scalar(t, mobius_add(-h, u_hyp)))
    return jnp.where(jnp.any(jnp.isnan(z)), jax.nn.relu(h), z)


if __name__ == "__main__":
    c = 1.0
    L = 3
    t = 0.5
    key = jax.random.PRNGKey(0)
    k_h, k_p = jax.random.split(key)

    # (dim, batches): dim=32 exercises lane packing (G=4, MXU seg_sum);
    # dim=128 exercises the G==1 XLU-reduce fallback path.
    configs = [(32, (16, 37, 1000)), (128, (64,))]

    for dim, batches in configs:
        log2_d = int(math.log2(dim))
        total = sum((dim // (2 * (1 << (l % log2_d)))) * 2 for l in range(L))
        kp = jax.random.fold_in(k_p, dim)
        params = 0.001 * jax.random.normal(kp, (total,), dtype=jnp.float32)

        for batch in batches:
            kh = jax.random.fold_in(jax.random.fold_in(k_h, dim), batch)
            # points inside the Poincare ball (||h|| < 1/sqrt(c))
            h = 0.05 * jax.random.normal(kh, (batch, dim), dtype=jnp.float32)

            z = geodesic_butterfly_layer(h, params, c=c, L=L, t=t)
            z = jax.block_until_ready(z)

            z_ref = reference(h, params, c=c, L=L, t=t)
            assert z.shape == (batch, dim)
            err = float(jnp.max(jnp.abs(z - z_ref)))
            assert jnp.allclose(z, z_ref, rtol=1e-4, atol=1e-5), \
                f"dim={dim} batch={batch} max abs err {err}"

    print("KERNEL_OK")
</pallas_src>

<mosaic_0001>
module attributes {stable_mosaic.version = 11 : i64} {
  func.func @_geodesic_butterfly_kernel(%arg0: i32, %arg1: memref<8x128xf32, #tpu.memory_space<vmem>>, %arg2: memref<3x128xf32, #tpu.memory_space<vmem>>, %arg3: memref<3x128xf32, #tpu.memory_space<vmem>>, %arg4: memref<3x128xf32, #tpu.memory_space<vmem>>, %arg5: memref<256x128xbf16, #tpu.memory_space<vmem>>, %arg6: memref<8x128xf32, #tpu.memory_space<vmem>>, %arg7: memref<8x128xf32, #tpu.memory_space<vmem>>) attributes {dimension_semantics = [#tpu.dimension_semantics<parallel>], iteration_bounds = array<i64: 1>, scalar_prefetch = 0 : i64, scratch_operands = 0 : i64, tpu.core_type = #tpu.core_type<tc>, window_params = [{transform_indices = @transform_0, window_bounds = array<i64: 8, 128>}, {pipeline_mode = #tpu.pipeline_mode<synchronous>, transform_indices = @transform_1, window_bounds = array<i64: 3, 128>}, {pipeline_mode = #tpu.pipeline_mode<synchronous>, transform_indices = @transform_2, window_bounds = array<i64: 3, 128>}, {pipeline_mode = #tpu.pipeline_mode<synchronous>, transform_indices = @transform_3, window_bounds = array<i64: 3, 128>}, {pipeline_mode = #tpu.pipeline_mode<synchronous>, transform_indices = @transform_4, window_bounds = array<i64: 256, 128>}, {transform_indices = @transform_5, window_bounds = array<i64: 8, 128>}, {transform_indices = @transform_6, window_bounds = array<i64: 8, 128>}]} {
    %c0 = arith.constant 0 : index
    %c0_0 = arith.constant 0 : index
    %0 = vector.load %arg1[%c0, %c0_0] : memref<8x128xf32, #tpu.memory_space<vmem>>, vector<8x128xf32>
    %c0_1 = arith.constant 0 : index
    %c0_2 = arith.constant 0 : index
    %1 = vector.load %arg5[%c0_1, %c0_2] : memref<256x128xbf16, #tpu.memory_space<vmem>>, vector<256x128xbf16>
    %2 = arith.mulf %0, %0 : vector<8x128xf32>
    %3 = arith.truncf %2 : vector<8x128xf32> to vector<8x128xbf16>
    %4 = arith.extf %3 : vector<8x128xbf16> to vector<8x128xf32>
    %5 = arith.subf %2, %4 : vector<8x128xf32>
    %6 = arith.truncf %5 : vector<8x128xf32> to vector<8x128xbf16>
    %7 = tpu.concatenate %3, %6 in 1 : vector<8x128xbf16>, vector<8x128xbf16> -> vector<8x256xbf16>
    %cst = arith.constant dense<0.000000e+00> : vector<8x128xf32>
    %8 = tpu.matmul %7, %1, %cst {dimension_numbers = #tpu.dot_dimension_numbers<[1], [0], [0], [1], [0, 0, 1, 1], [], []>} : vector<8x256xbf16>, vector<256x128xbf16>, vector<8x128xf32> -> vector<8x128xf32>
    %cst_3 = arith.constant 1.000000e+00 : f32
    %9 = vector.broadcast %cst_3 : f32 to vector<8x128xf32>
    %10 = arith.mulf %9, %8 : vector<8x128xf32>
    %cst_4 = arith.constant 9.99999982E-15 : f32
    %11 = vector.broadcast %cst_4 : f32 to vector<8x128xf32>
    %12 = arith.maximumf %10, %11 : vector<8x128xf32>
    %13 = math.rsqrt %12 : vector<8x128xf32>
    %14 = arith.mulf %12, %13 : vector<8x128xf32>
    %cst_5 = arith.constant 0.000000e+00 : f32
    %cst_6 = arith.constant 0.999989986 : f32
    %15 = arith.subf %cst_5, %cst_6 : f32
    %cst_7 = arith.constant 0.999989986 : f32
    %16 = vector.broadcast %15 : f32 to vector<8x128xf32>
    %17 = arith.maximumf %16, %14 : vector<8x128xf32>
    %18 = vector.broadcast %cst_7 : f32 to vector<8x128xf32>
    %19 = arith.minimumf %18, %17 : vector<8x128xf32>
    %cst_8 = arith.constant 1.000000e+00 : f32
    %20 = vector.broadcast %cst_8 : f32 to vector<8x128xf32>
    %21 = arith.addf %20, %19 : vector<8x128xf32>
    %22 = math.log %21 : vector<8x128xf32>
    %cst_9 = arith.constant 1.000000e+00 : f32
    %23 = vector.broadcast %cst_9 : f32 to vector<8x128xf32>
    %24 = arith.subf %23, %19 : vector<8x128xf32>
    %25 = math.log %24 : vector<8x128xf32>
    %26 = arith.subf %22, %25 : vector<8x128xf32>
    %cst_10 = arith.constant 5.000000e-01 : f32
    %27 = vector.broadcast %cst_10 : f32 to vector<8x128xf32>
    %28 = arith.mulf %27, %26 : vector<8x128xf32>
    %29 = arith.mulf %28, %13 : vector<8x128xf32>
    %30 = arith.mulf %29, %0 : vector<8x128xf32>
    %c0_11 = arith.constant 0 : index
    %c0_12 = arith.constant 0 : index
    %31 = vector.load %arg2[%c0_11, %c0_12] : memref<3x128xf32, #tpu.memory_space<vmem>>, vector<1x128xf32>
    %32 = vector.shape_cast %31 : vector<1x128xf32> to vector<128xf32>
    %33 = vector.shape_cast %32 : vector<128xf32> to vector<1x128xf32>
    %c0_13 = arith.constant 0 : index
    %c0_14 = arith.constant 0 : index
    %34 = vector.load %arg3[%c0_13, %c0_14] : memref<3x128xf32, #tpu.memory_space<vmem>>, vector<1x128xf32>
    %35 = vector.shape_cast %34 : vector<1x128xf32> to vector<128xf32>
    %36 = vector.shape_cast %35 : vector<128xf32> to vector<1x128xf32>
    %c0_15 = arith.constant 0 : index
    %c0_16 = arith.constant 0 : index
    %37 = vector.load %arg4[%c0_15, %c0_16] : memref<3x128xf32, #tpu.memory_space<vmem>>, vector<1x128xf32>
    %38 = vector.shape_cast %37 : vector<1x128xf32> to vector<128xf32>
    %39 = vector.shape_cast %38 : vector<128xf32> to vector<1x128xf32>
    %40 = vector.broadcast %33 : vector<1x128xf32> to vector<8x128xf32>
    %41 = arith.mulf %40, %30 : vector<8x128xf32>
    %c127_i32 = arith.constant 127 : i32
    %42 = tpu.dynamic_rotate %30 by %c127_i32 dim 1 : vector<8x128xf32>, i32 -> vector<8x128xf32>
    %43 = vector.broadcast %36 : vector<1x128xf32> to vector<8x128xf32>
    %44 = arith.mulf %43, %42 : vector<8x128xf32>
    %45 = arith.addf %41, %44 : vector<8x128xf32>
    %c1_i32 = arith.constant 1 : i32
    %46 = tpu.dynamic_rotate %30 by %c1_i32 dim 1 : vector<8x128xf32>, i32 -> vector<8x128xf32>
    %47 = vector.broadcast %39 : vector<1x128xf32> to vector<8x128xf32>
    %48 = arith.mulf %47, %46 : vector<8x128xf32>
    %49 = arith.addf %45, %48 : vector<8x128xf32>
    %c1 = arith.constant 1 : index
    %c0_17 = arith.constant 0 : index
    %50 = vector.load %arg2[%c1, %c0_17] : memref<3x128xf32, #tpu.memory_space<vmem>>, vector<1x128xf32>
    %51 = vector.shape_cast %50 : vector<1x128xf32> to vector<128xf32>
    %52 = vector.shape_cast %51 : vector<128xf32> to vector<1x128xf32>
    %c1_18 = arith.constant 1 : index
    %c0_19 = arith.constant 0 : index
    %53 = vector.load %arg3[%c1_18, %c0_19] : memref<3x128xf32, #tpu.memory_space<vmem>>, vector<1x128xf32>
    %54 = vector.shape_cast %53 : vector<1x128xf32> to vector<128xf32>
    %55 = vector.shape_cast %54 : vector<128xf32> to vector<1x128xf32>
    %c1_20 = arith.constant 1 : index
    %c0_21 = arith.constant 0 : index
    %56 = vector.load %arg4[%c1_20, %c0_21] : memref<3x128xf32, #tpu.memory_space<vmem>>, vector<1x128xf32>
    %57 = vector.shape_cast %56 : vector<1x128xf32> to vector<128xf32>
    %58 = vector.shape_cast %57 : vector<128xf32> to vector<1x128xf32>
    %59 = vector.broadcast %52 : vector<1x128xf32> to vector<8x128xf32>
    %60 = arith.mulf %59, %49 : vector<8x128xf32>
    %c126_i32 = arith.constant 126 : i32
    %61 = tpu.dynamic_rotate %49 by %c126_i32 dim 1 : vector<8x128xf32>, i32 -> vector<8x128xf32>
    %62 = vector.broadcast %55 : vector<1x128xf32> to vector<8x128xf32>
    %63 = arith.mulf %62, %61 : vector<8x128xf32>
    %64 = arith.addf %60, %63 : vector<8x128xf32>
    %c2_i32 = arith.constant 2 : i32
    %65 = tpu.dynamic_rotate %49 by %c2_i32 dim 1 : vector<8x128xf32>, i32 -> vector<8x128xf32>
    %66 = vector.broadcast %58 : vector<1x128xf32> to vector<8x128xf32>
    %67 = arith.mulf %66, %65 : vector<8x128xf32>
    %68 = arith.addf %64, %67 : vector<8x128xf32>
    %c2 = arith.constant 2 : index
    %c0_22 = arith.constant 0 : index
    %69 = vector.load %arg2[%c2, %c0_22] : memref<3x128xf32, #tpu.memory_space<vmem>>, vector<1x128xf32>
    %70 = vector.shape_cast %69 : vector<1x128xf32> to vector<128xf32>
    %71 = vector.shape_cast %70 : vector<128xf32> to vector<1x128xf32>
    %c2_23 = arith.constant 2 : index
    %c0_24 = arith.constant 0 : index
    %72 = vector.load %arg3[%c2_23, %c0_24] : memref<3x128xf32, #tpu.memory_space<vmem>>, vector<1x128xf32>
    %73 = vector.shape_cast %72 : vector<1x128xf32> to vector<128xf32>
    %74 = vector.shape_cast %73 : vector<128xf32> to vector<1x128xf32>
    %c2_25 = arith.constant 2 : index
    %c0_26 = arith.constant 0 : index
    %75 = vector.load %arg4[%c2_25, %c0_26] : memref<3x128xf32, #tpu.memory_space<vmem>>, vector<1x128xf32>
    %76 = vector.shape_cast %75 : vector<1x128xf32> to vector<128xf32>
    %77 = vector.shape_cast %76 : vector<128xf32> to vector<1x128xf32>
    %78 = vector.broadcast %71 : vector<1x128xf32> to vector<8x128xf32>
    %79 = arith.mulf %78, %68 : vector<8x128xf32>
    %c124_i32 = arith.constant 124 : i32
    %80 = tpu.dynamic_rotate %68 by %c124_i32 dim 1 : vector<8x128xf32>, i32 -> vector<8x128xf32>
    %81 = vector.broadcast %74 : vector<1x128xf32> to vector<8x128xf32>
    %82 = arith.mulf %81, %80 : vector<8x128xf32>
    %83 = arith.addf %79, %82 : vector<8x128xf32>
    %c4_i32 = arith.constant 4 : i32
    %84 = tpu.dynamic_rotate %68 by %c4_i32 dim 1 : vector<8x128xf32>, i32 -> vector<8x128xf32>
    %85 = vector.broadcast %77 : vector<1x128xf32> to vector<8x128xf32>
    %86 = arith.mulf %85, %84 : vector<8x128xf32>
    %87 = arith.addf %83, %86 : vector<8x128xf32>
    %88 = arith.mulf %87, %87 : vector<8x128xf32>
    %89 = arith.truncf %88 : vector<8x128xf32> to vector<8x128xbf16>
    %90 = arith.extf %89 : vector<8x128xbf16> to vector<8x128xf32>
    %91 = arith.subf %88, %90 : vector<8x128xf32>
    %92 = arith.truncf %91 : vector<8x128xf32> to vector<8x128xbf16>
    %93 = tpu.concatenate %89, %92 in 1 : vector<8x128xbf16>, vector<8x128xbf16> -> vector<8x256xbf16>
    %cst_27 = arith.constant dense<0.000000e+00> : vector<8x128xf32>
    %94 = tpu.matmul %93, %1, %cst_27 {dimension_numbers = #tpu.dot_dimension_numbers<[1], [0], [0], [1], [0, 0, 1, 1], [], []>} : vector<8x256xbf16>, vector<256x128xbf16>, vector<8x128xf32> -> vector<8x128xf32>
    %cst_28 = arith.constant 1.000000e+00 : f32
    %95 = vector.broadcast %cst_28 : f32 to vector<8x128xf32>
    %96 = arith.mulf %95, %94 : vector<8x128xf32>
    %cst_29 = arith.constant 9.99999982E-15 : f32
    %97 = vector.broadcast %cst_29 : f32 to vector<8x128xf32>
    %98 = arith.maximumf %96, %97 : vector<8x128xf32>
    %99 = math.rsqrt %98 : vector<8x128xf32>
    %100 = arith.mulf %98, %99 : vector<8x128xf32>
    %101 = math.tanh %100 : vector<8x128xf32>
    %102 = arith.mulf %101, %99 : vector<8x128xf32>
    %103 = arith.mulf %102, %87 : vector<8x128xf32>
    %104 = arith.mulf %102, %102 : vector<8x128xf32>
    %105 = arith.mulf %104, %94 : vector<8x128xf32>
    %cst_30 = arith.constant 0.000000e+00 : f32
    %106 = vector.broadcast %cst_30 : f32 to vector<8x128xf32>
    %107 = arith.subf %106, %0 : vector<8x128xf32>
    %108 = arith.mulf %107, %103 : vector<8x128xf32>
    %109 = arith.truncf %108 : vector<8x128xf32> to vector<8x128xbf16>
    %110 = arith.extf %109 : vector<8x128xbf16> to vector<8x128xf32>
    %111 = arith.subf %108, %110 : vector<8x128xf32>
    %112 = arith.truncf %111 : vector<8x128xf32> to vector<8x128xbf16>
    %113 = tpu.concatenate %109, %112 in 1 : vector<8x128xbf16>, vector<8x128xbf16> -> vector<8x256xbf16>
    %cst_31 = arith.constant dense<0.000000e+00> : vector<8x128xf32>
    %114 = tpu.matmul %113, %1, %cst_31 {dimension_numbers = #tpu.dot_dimension_numbers<[1], [0], [0], [1], [0, 0, 1, 1], [], []>} : vector<8x256xbf16>, vector<256x128xbf16>, vector<8x128xf32> -> vector<8x128xf32>
    %cst_32 = arith.constant 2.000000e+00 : f32
    %cst_33 = arith.constant 1.000000e+00 : f32
    %115 = arith.mulf %cst_32, %cst_33 : f32
    %116 = vector.broadcast %115 : f32 to vector<8x128xf32>
    %117 = arith.mulf %116, %114 : vector<8x128xf32>
    %cst_34 = arith.constant 1.000000e+00 : f32
    %118 = vector.broadcast %cst_34 : f32 to vector<8x128xf32>
    %119 = arith.addf %118, %117 : vector<8x128xf32>
    %cst_35 = arith.constant 1.000000e+00 : f32
    %120 = vector.broadcast %cst_35 : f32 to vector<8x128xf32>
    %121 = arith.mulf %120, %105 : vector<8x128xf32>
    %122 = arith.addf %119, %121 : vector<8x128xf32>
    %123 = arith.mulf %122, %107 : vector<8x128xf32>
    %cst_36 = arith.constant 1.000000e+00 : f32
    %124 = vector.broadcast %cst_36 : f32 to vector<8x128xf32>
    %125 = arith.mulf %124, %8 : vector<8x128xf32>
    %cst_37 = arith.constant 1.000000e+00 : f32
    %126 = vector.broadcast %cst_37 : f32 to vector<8x128xf32>
    %127 = arith.subf %126, %125 : vector<8x128xf32>
    %128 = arith.mulf %127, %103 : vector<8x128xf32>
    %129 = arith.addf %123, %128 : vector<8x128xf32>
    %cst_38 = arith.constant 2.000000e+00 : f32
    %cst_39 = arith.constant 1.000000e+00 : f32
    %130 = arith.mulf %cst_38, %cst_39 : f32
    %131 = vector.broadcast %130 : f32 to vector<8x128xf32>
    %132 = arith.mulf %131, %114 : vector<8x128xf32>
    %cst_40 = arith.constant 1.000000e+00 : f32
    %133 = vector.broadcast %cst_40 : f32 to vector<8x128xf32>
    %134 = arith.addf %133, %132 : vector<8x128xf32>
    %cst_41 = arith.constant 1.000000e+00 : f32
    %cst_42 = arith.constant 1.000000e+00 : f32
    %135 = arith.mulf %cst_41, %cst_42 : f32
    %136 = vector.broadcast %135 : f32 to vector<8x128xf32>
    %137 = arith.mulf %136, %8 : vector<8x128xf32>
    %138 = arith.mulf %137, %105 : vector<8x128xf32>
    %139 = arith.addf %134, %138 : vector<8x128xf32>
    %cst_43 = arith.constant 1.000000e-07 : f32
    %140 = vector.broadcast %cst_43 : f32 to vector<8x128xf32>
    %141 = arith.maximumf %139, %140 : vector<8x128xf32>
    %142 = tpu.reciprocal %141 {approx = true} : vector<8x128xf32> -> vector<8x128xf32>
    %143 = arith.mulf %141, %142 : vector<8x128xf32>
    %cst_44 = arith.constant 2.000000e+00 : f32
    %144 = vector.broadcast %cst_44 : f32 to vector<8x128xf32>
    %145 = arith.subf %144, %143 : vector<8x128xf32>
    %146 = arith.mulf %142, %145 : vector<8x128xf32>
    %147 = arith.mulf %129, %146 : vector<8x128xf32>
    %148 = arith.mulf %147, %147 : vector<8x128xf32>
    %149 = arith.truncf %148 : vector<8x128xf32> to vector<8x128xbf16>
    %150 = arith.extf %149 : vector<8x128xbf16> to vector<8x128xf32>
    %151 = arith.subf %148, %150 : vector<8x128xf32>
    %152 = arith.truncf %151 : vector<8x128xf32> to vector<8x128xbf16>
    %153 = tpu.concatenate %149, %152 in 1 : vector<8x128xbf16>, vector<8x128xbf16> -> vector<8x256xbf16>
    %cst_45 = arith.constant dense<0.000000e+00> : vector<8x128xf32>
    %154 = tpu.matmul %153, %1, %cst_45 {dimension_numbers = #tpu.dot_dimension_numbers<[1], [0], [0], [1], [0, 0, 1, 1], [], []>} : vector<8x256xbf16>, vector<256x128xbf16>, vector<8x128xf32> -> vector<8x128xf32>
    %cst_46 = arith.constant 1.000000e+00 : f32
    %155 = vector.broadcast %cst_46 : f32 to vector<8x128xf32>
    %156 = arith.mulf %155, %154 : vector<8x128xf32>
    %cst_47 = arith.constant 9.99999982E-15 : f32
    %157 = vector.broadcast %cst_47 : f32 to vector<8x128xf32>
    %158 = arith.maximumf %156, %157 : vector<8x128xf32>
    %159 = math.rsqrt %158 : vector<8x128xf32>
    %160 = arith.mulf %158, %159 : vector<8x128xf32>
    %cst_48 = arith.constant 0.000000e+00 : f32
    %cst_49 = arith.constant 0.999989986 : f32
    %161 = arith.subf %cst_48, %cst_49 : f32
    %cst_50 = arith.constant 0.999989986 : f32
    %162 = vector.broadcast %161 : f32 to vector<8x128xf32>
    %163 = arith.maximumf %162, %160 : vector<8x128xf32>
    %164 = vector.broadcast %cst_50 : f32 to vector<8x128xf32>
    %165 = arith.minimumf %164, %163 : vector<8x128xf32>
    %cst_51 = arith.constant 1.000000e+00 : f32
    %166 = vector.broadcast %cst_51 : f32 to vector<8x128xf32>
    %167 = arith.addf %166, %165 : vector<8x128xf32>
    %168 = math.log %167 : vector<8x128xf32>
    %cst_52 = arith.constant 1.000000e+00 : f32
    %169 = vector.broadcast %cst_52 : f32 to vector<8x128xf32>
    %170 = arith.subf %169, %165 : vector<8x128xf32>
    %171 = math.log %170 : vector<8x128xf32>
    %172 = arith.subf %168, %171 : vector<8x128xf32>
    %cst_53 = arith.constant 5.000000e-01 : f32
    %173 = vector.broadcast %cst_53 : f32 to vector<8x128xf32>
    %174 = arith.mulf %173, %172 : vector<8x128xf32>
    %cst_54 = arith.constant 5.000000e-01 : f32
    %175 = vector.broadcast %cst_54 : f32 to vector<8x128xf32>
    %176 = arith.mulf %175, %174 : vector<8x128xf32>
    %177 = math.tanh %176 : vector<8x128xf32>
    %178 = arith.mulf %177, %159 : vector<8x128xf32>
    %179 = arith.mulf %178, %147 : vector<8x128xf32>
    %180 = arith.mulf %178, %178 : vector<8x128xf32>
    %181 = arith.mulf %180, %154 : vector<8x128xf32>
    %182 = arith.mulf %0, %179 : vector<8x128xf32>
    %183 = arith.truncf %182 : vector<8x128xf32> to vector<8x128xbf16>
    %184 = arith.extf %183 : vector<8x128xbf16> to vector<8x128xf32>
    %185 = arith.subf %182, %184 : vector<8x128xf32>
    %186 = arith.truncf %185 : vector<8x128xf32> to vector<8x128xbf16>
    %187 = tpu.concatenate %183, %186 in 1 : vector<8x128xbf16>, vector<8x128xbf16> -> vector<8x256xbf16>
    %cst_55 = arith.constant dense<0.000000e+00> : vector<8x128xf32>
    %188 = tpu.matmul %187, %1, %cst_55 {dimension_numbers = #tpu.dot_dimension_numbers<[1], [0], [0], [1], [0, 0, 1, 1], [], []>} : vector<8x256xbf16>, vector<256x128xbf16>, vector<8x128xf32> -> vector<8x128xf32>
    %cst_56 = arith.constant 2.000000e+00 : f32
    %cst_57 = arith.constant 1.000000e+00 : f32
    %189 = arith.mulf %cst_56, %cst_57 : f32
    %190 = vector.broadcast %189 : f32 to vector<8x128xf32>
    %191 = arith.mulf %190, %188 : vector<8x128xf32>
    %cst_58 = arith.constant 1.000000e+00 : f32
    %192 = vector.broadcast %cst_58 : f32 to vector<8x128xf32>
    %193 = arith.addf %192, %191 : vector<8x128xf32>
    %cst_59 = arith.constant 1.000000e+00 : f32
    %194 = vector.broadcast %cst_59 : f32 to vector<8x128xf32>
    %195 = arith.mulf %194, %181 : vector<8x128xf32>
    %196 = arith.addf %193, %195 : vector<8x128xf32>
    %197 = arith.mulf %196, %0 : vector<8x128xf32>
    %cst_60 = arith.constant 1.000000e+00 : f32
    %198 = vector.broadcast %cst_60 : f32 to vector<8x128xf32>
    %199 = arith.mulf %198, %8 : vector<8x128xf32>
    %cst_61 = arith.constant 1.000000e+00 : f32
    %200 = vector.broadcast %cst_61 : f32 to vector<8x128xf32>
    %201 = arith.subf %200, %199 : vector<8x128xf32>
    %202 = arith.mulf %201, %179 : vector<8x128xf32>
    %203 = arith.addf %197, %202 : vector<8x128xf32>
    %cst_62 = arith.constant 2.000000e+00 : f32
    %cst_63 = arith.constant 1.000000e+00 : f32
    %204 = arith.mulf %cst_62, %cst_63 : f32
    %205 = vector.broadcast %204 : f32 to vector<8x128xf32>
    %206 = arith.mulf %205, %188 : vector<8x128xf32>
    %cst_64 = arith.constant 1.000000e+00 : f32
    %207 = vector.broadcast %cst_64 : f32 to vector<8x128xf32>
    %208 = arith.addf %207, %206 : vector<8x128xf32>
    %cst_65 = arith.constant 1.000000e+00 : f32
    %cst_66 = arith.constant 1.000000e+00 : f32
    %209 = arith.mulf %cst_65, %cst_66 : f32
    %210 = vector.broadcast %209 : f32 to vector<8x128xf32>
    %211 = arith.mulf %210, %8 : vector<8x128xf32>
    %212 = arith.mulf %211, %181 : vector<8x128xf32>
    %213 = arith.addf %208, %212 : vector<8x128xf32>
    %cst_67 = arith.constant 1.000000e-07 : f32
    %214 = vector.broadcast %cst_67 : f32 to vector<8x128xf32>
    %215 = arith.maximumf %213, %214 : vector<8x128xf32>
    %216 = tpu.reciprocal %215 {approx = true} : vector<8x128xf32> -> vector<8x128xf32>
    %217 = arith.mulf %215, %216 : vector<8x128xf32>
    %cst_68 = arith.constant 2.000000e+00 : f32
    %218 = vector.broadcast %cst_68 : f32 to vector<8x128xf32>
    %219 = arith.subf %218, %217 : vector<8x128xf32>
    %220 = arith.mulf %216, %219 : vector<8x128xf32>
    %221 = arith.mulf %203, %220 : vector<8x128xf32>
    %c0_69 = arith.constant 0 : index
    %c0_70 = arith.constant 0 : index
    %222 = vector.load %arg6[%c0_69, %c0_70] : memref<8x128xf32, #tpu.memory_space<vmem>>, vector<8x128xf32>
    tpu.vector_store %arg6[%c0_69, %c0_70], %221 {strides = array<i32>} : memref<8x128xf32, #tpu.memory_space<vmem>>, vector<8x128xf32>,
    %223 = arith.cmpf one, %221, %221 : vector<8x128xf32>
    %224 = arith.extui %223 : vector<8x128xi1> to vector<8x128xi32>
    %225 = arith.sitofp %224 : vector<8x128xi32> to vector<8x128xf32>
    %cst_71 = arith.constant dense<0xFF800000> : vector<8xf32>
    %226 = vector.multi_reduction <maximumf>, %225, %cst_71 [1] : vector<8x128xf32> to vector<8xf32>
    %227 = vector.shape_cast %226 : vector<8xf32> to vector<8x1xf32>
    %cst_72 = arith.constant dense<0xFF800000> : vector<1xf32>
    %228 = vector.multi_reduction <maximumf>, %227, %cst_72 [0] : vector<8x1xf32> to vector<1xf32>
    %229 = vector.shape_cast %228 : vector<1xf32> to vector<1x1xf32>
    %230 = vector.shape_cast %229 : vector<1x1xf32> to vector<1x1xf32>
    %231 = vector.broadcast %230 : vector<1x1xf32> to vector<8x128xf32>
    %c0_73 = arith.constant 0 : index
    %c0_74 = arith.constant 0 : index
    %232 = vector.load %arg7[%c0_73, %c0_74] : memref<8x128xf32, #tpu.memory_space<vmem>>, vector<8x128xf32>
    tpu.vector_store %arg7[%c0_73, %c0_74], %231 {strides = array<i32>} : memref<8x128xf32, #tpu.memory_space<vmem>>, vector<8x128xf32>,
    return
  }
  func.func @transform_0(%arg0: i32) -> (i32, i32) {
    %c0_i32 = arith.constant 0 : i32
    %c0_i32_0 = arith.constant 0 : i32
    return %arg0, %c0_i32 : i32, i32
  }
  func.func @transform_1(%arg0: i32) -> (i32, i32) {
    %c0_i32 = arith.constant 0 : i32
    %c0_i32_0 = arith.constant 0 : i32
    %c0_i32_1 = arith.constant 0 : i32
    return %c0_i32, %c0_i32_0 : i32, i32
  }
  func.func @transform_2(%arg0: i32) -> (i32, i32) {
    %c0_i32 = arith.constant 0 : i32
    %c0_i32_0 = arith.constant 0 : i32
    %c0_i32_1 = arith.constant 0 : i32
    return %c0_i32, %c0_i32_0 : i32, i32
  }
  func.func @transform_3(%arg0: i32) -> (i32, i32) {
    %c0_i32 = arith.constant 0 : i32
    %c0_i32_0 = arith.constant 0 : i32
    %c0_i32_1 = arith.constant 0 : i32
    return %c0_i32, %c0_i32_0 : i32, i32
  }
  func.func @transform_4(%arg0: i32) -> (i32, i32) {
    %c0_i32 = arith.constant 0 : i32
    %c0_i32_0 = arith.constant 0 : i32
    %c0_i32_1 = arith.constant 0 : i32
    return %c0_i32, %c0_i32_0 : i32, i32
  }
  func.func @transform_5(%arg0: i32) -> (i32, i32) {
    %c0_i32 = arith.constant 0 : i32
    %c0_i32_0 = arith.constant 0 : i32
    return %arg0, %c0_i32 : i32, i32
  }
  func.func @transform_6(%arg0: i32) -> (i32, i32) {
    %c0_i32 = arith.constant 0 : i32
    %c0_i32_0 = arith.constant 0 : i32
    return %arg0, %c0_i32 : i32, i32
  }
}

</mosaic_0001>

<bundles_post_ra>
// kernel: tpu_custom_call.1
= control target key start
LH: loop header
LB: loop body
LE: loop exit
PB: predicated region body
PF: predicated region fallthrough
CT: control target
= control target key end

     0   :  { %12 = vsyncpa [#allocation3], 0  ;;  %s1144_s0 = inlined_call_operand.hbm [shape: f32[8,128], index: 0, kind: input, shape index: {}]   ;;  %s1145_s1 = inlined_call_operand.hbm [shape: f32[3,128], index: 1, kind: input, shape index: {}]   ;;  %s1146_s2 = inlined_call_operand.hbm [shape: f32[3,128], index: 2, kind: input, shape index: {}]   ;;  %s1147_s3 = inlined_call_operand.vmem [shape: f32[3,128], index: 3, kind: input, shape index: {}]   ;;  %s1148_s4 = inlined_call_operand.hbm [shape: bf16[256,128], index: 4, kind: input, shape index: {}]   ;;  %s1149_s5 = inlined_call_operand.hbm [shape: f32[8,128], index: 5, kind: output, shape index: {0}]   ;;  %s1150_s6 = inlined_call_operand.hbm [shape: f32[8,128], index: 6, kind: output, shape index: {1}]  }
   0x1   :  { %13 = vsyncpa [#allocation6], 0 }
   0x2   :  { %14 = vsyncpa [#allocation9], 0 }
   0x3   :  { %15 = vsyncpa [#allocation4], 0 }
   0x4   :  { %16 = vsyncpa [#allocation12], 0  ;;  %s936_s21 = smov [#allocation5]   ;;  %s937_s23 = smov [#allocation2]  }
   0x5   :  { %s33_s22 = sshll.u32 %s936_s21, 4  ;;  %s23_s24 = sshll.u32 %s937_s23, 4  ;;  %s34_s22 = int_to_ptr.vmem [resolvable:$true] %s33_s22  ;;  %s24_s24 = int_to_ptr.vmem [resolvable:$true] %s23_s24 }
   0x6   :  { %s814_s25 = scalar_lea.vmem %s34_s22, 64  ;;  %p819_p1 = scmp.lt.s32.totalorder %s34_s22, %s34_s22 }
   0x7   :  { %p815_p0 = scmp.ne.s32.totalorder %s34_s22, %s814_s25  ;;  %p820_p2 = scmp.lt.s32.totalorder %s814_s25, %s814_s25 }
   0x9   :  { %p821_p3 = por %p820_p2, %p819_p1 }
   0xb   :  { %p822_p4 = pnand %p821_p3, %p815_p0 }
   0xd   :  { %825 = shalt.err (!%p822_p4)
}
   0xe   :  { %36 = dma.hbm_to_vmem [thread:$0]  %s1145_s1, 64, %s34_s22, [#allocation6]  }
   0xf   :  { %s834_s28 = scalar_lea.vmem %s24_s24, 128  ;;  %p839_p6 = scmp.lt.s32.totalorder %s24_s24, %s24_s24 }
  0x10   :  { %p835_p5 = scmp.ne.s32.totalorder %s24_s24, %s834_s28  ;;  %p840_p7 = scmp.lt.s32.totalorder %s834_s28, %s834_s28 }
  0x12   :  { %p841_p8 = por %p840_p7, %p839_p6 }
  0x14   :  { %p842_p9 = pnand %p841_p8, %p835_p5 }
  0x16   :  { %845 = shalt.err (!%p842_p9)
}
  0x17   :  { %26 = dma.hbm_to_vmem [thread:$0]  %s1144_s0, 128, %s24_s24, [#allocation3]  }
  0x18   :  { %s938_s7 = smov [#allocation7]   ;;  %s939_s9 = smov [#allocation8]  }
  0x19   :  { %s43_s8 = sshll.u32 %s938_s7, 4  ;;  %s54_s10 = sshll.u32 %s939_s9, 4  ;;  %s44_s8 = int_to_ptr.vmem [resolvable:$true] %s43_s8  ;;  %s55_s10 = int_to_ptr.vmem [resolvable:$true] %s54_s10 }
  0x1a   :  { %s854_s11 = scalar_lea.vmem %s44_s8, 64  ;;  %p859_p11 = scmp.lt.s32.totalorder %s44_s8, %s44_s8 }
  0x1b   :  { %p855_p10 = scmp.ne.s32.totalorder %s44_s8, %s854_s11  ;;  %p860_p12 = scmp.lt.s32.totalorder %s854_s11, %s854_s11 }
  0x1d   :  { %p861_p13 = por %p860_p12, %p859_p11 }
  0x1f   :  { %p862_p0 = pnand %p861_p13, %p855_p10 }
  0x21   :  { %865 = shalt.err (!%p862_p0)
}
  0x22   :  { %46 = dma.hbm_to_vmem [thread:$0]  %s1146_s2, 64, %s44_s8, [#allocation6]  }
  0x23   :  { %s874_s13 = scalar_lea.vmem %s55_s10, 2048  ;;  %p879_p2 = scmp.lt.s32.totalorder %s55_s10, %s55_s10 }
  0x24   :  { %p875_p1 = scmp.ne.s32.totalorder %s55_s10, %s874_s13  ;;  %p880_p3 = scmp.lt.s32.totalorder %s874_s13, %s874_s13 }
  0x26   :  { %p881_p4 = por %p880_p3, %p879_p2 }
  0x28   :  { %p882_p5 = pnand %p881_p4, %p875_p1 }
  0x2a   :  { %885 = shalt.err (!%p882_p5)
}
  0x2b   :  { %s940_s0 = smov 64   ;;  %s941_s14 = smov 4  }
  0x2c   :  { %60 = dma.hbm_to_vmem [thread:$0]  %s1148_s4, 2048, %s55_s10, [#allocation9], %s940_s0, %s940_s0, %s941_s14  }
  0x2d   :  { %926 = dma.done.wait [#allocation3], 128  }
  0x2e   :  { %927 = vsyncadd [#allocation3], 4294967168 }
  0x2f   :  { %928 = dma.done.wait [#allocation6], 128  }
  0x30   :  { %929 = vsyncadd [#allocation6], 4294967168 }
  0x31   :  { %930 = dma.done.wait [#allocation9], 2048  }
  0x32   :  { %931 = vsyncadd [#allocation9], 4294965248  ;;  %v998_v0 = vld [vmem:[#allocation8 + $0x78] sm:$0xff]   ;;  %v1003_v2 = vld [vmem:[#allocation8 + $0x70] sm:$0xff]   ;;  %s942_s2 = smov 127   ;;  %s943_s4 = smov 1  }
  0x33   :  { %v1000_v1 = vld [vmem:[#allocation8 + $0x38] sm:$0xff]   ;;  %644 = vmatprep.subr.bf16.mxu0 %v998_v0  ;;  %666 = vmatprep.subr.bf16.mxu1 %v998_v0  ;;  %v1007_v3 = vld [vmem:[#allocation8 + $0x30] sm:$0xff]   ;;  %v1011_v4 = vld [vmem:[#allocation8 + $0x68] sm:$0xff]   ;;  %s944_s19 = smov 126   ;;  %s945_s20 = smov 2  }
  0x34   :  { %645 = vmatpush3.bf16.msra.mxu0 %v1000_v1  ;;  %667 = vmatpush3.bf16.msra.mxu1 %v1000_v1  ;;  %v1015_v5 = vld [vmem:[#allocation8 + $0x28] sm:$0xff]   ;;  %v1019_v6 = vld [vmem:[#allocation8 + $0x60] sm:$0xff]   ;;  %v1027_v8 = vld [vmem:[#allocation8 + $0x58] sm:$0xff]   ;;  %s946_s23 = smov 124  }
  0x35   :  { %646 = vmatprep.subr.bf16.mxu0 %v1003_v2  ;;  %668 = vmatprep.subr.bf16.mxu1 %v1003_v2  ;;  %v1023_v7 = vld [vmem:[#allocation8 + $0x20] sm:$0xff]   ;;  %v1031_v9 = vld [vmem:[#allocation8 + $0x18] sm:$0xff]   ;;  %v1035_v10 = vld [vmem:[#allocation8 + $0x50] sm:$0xff]  }
  0x36   :  { %v1037_v11 = vld [vmem:[#allocation2] sm:$0xff]  ;;  %v1047_v15 = vld [vmem:[#allocation8 + $0x48] sm:$0xff]   ;;  %v1055_v19 = vld [vmem:[#allocation8 + $0x40] sm:$0xff]  }
  0x37   :  { %v107_v12 = vmul.f32 %v1037_v11, %v1037_v11  ;;  %v1043_v13 = vld [vmem:[#allocation8 + $0x10] sm:$0xff]   ;;  %v1051_v17 = vld [vmem:[#allocation8 + $0x8] sm:$0xff]   ;;  %v1059_v21 = vld [vmem:[#allocation8] sm:$0xff]  }
  0x38   :  { %647 = vmatpush3.bf16.msra.mxu0 %v1007_v3  ;;  %669 = vmatpush3.bf16.msra.mxu1 %v1007_v3  ;;  %v634_v41 = vld [vmem:[#allocation7] ss:$0 sm:$0xff]  ;;  %v633_v42 = vld [vmem:[#allocation5] ss:$0 sm:$0xff]  ;;  %v635_v45 = vld [vmem:[%s1147_s3] ss:$0 sm:$0xff] }
  0x39   :  { %648 = vmatprep.subr.bf16.mxu0 %v1011_v4  ;;  %670 = vmatprep.subr.bf16.mxu1 %v1011_v4  ;;  %v108_v14 = vpack.c.bf16 %v107_v12, %v107_v12  ;;  %v637_v51 = vld [vmem:[#allocation7 + $0x1] ss:$0 sm:$0xff]  ;;  %v636_v52 = vld [vmem:[#allocation5 + $0x1] ss:$0 sm:$0xff]  ;;  %v638_v55 = vld [vmem:[%s1147_s3 + $0x1] ss:$0 sm:$0xff] }
  0x3a   :  { %v639_v61 = vld [vmem:[#allocation5 + $0x2] ss:$0 sm:$0xff]  ;;  %v640_v62 = vld [vmem:[#allocation7 + $0x2] ss:$0 sm:$0xff]  ;;  %v641_v63 = vld [vmem:[%s1147_s3 + $0x2] ss:$0 sm:$0xff] }
  0x3b   :  { %v109_v16 = vunpack.c.l.bf16 %v108_v14  ;;  %s948_s3 = smov [#allocation10]  }
  0x3c   :  { %649 = vmatpush3.bf16.msra.mxu0 %v1015_v5  ;;  %671 = vmatpush3.bf16.msra.mxu1 %v1015_v5  ;;  %s591_s26 = sshll.u32 %s948_s3, 4  ;;  %s592_s26 = int_to_ptr.vmem [resolvable:$true] %s591_s26 }
  0x3d   :  { %650 = vmatprep.subr.bf16.mxu0 %v1019_v6  ;;  %672 = vmatprep.subr.bf16.mxu1 %v1019_v6  ;;  %v110_v18 = vsub.f32 %v107_v12, %v109_v16  ;;  %s886_s27 = scalar_lea.vmem %s592_s26, 128  ;;  %p891_p7 = scmp.lt.s32.totalorder %s592_s26, %s592_s26 }
  0x3e   :  { %p887_p6 = scmp.ne.s32.totalorder %s592_s26, %s886_s27  ;;  %p892_p8 = scmp.lt.s32.totalorder %s886_s27, %s886_s27 }
  0x3f   :  { %v111_v20 = vpack.c.bf16 %v110_v18, %v110_v18 }
  0x40   :  { %651 = vmatpush3.bf16.msra.mxu0 %v1023_v7  ;;  %673 = vmatpush3.bf16.msra.mxu1 %v1023_v7  ;;  %p893_p9 = por %p892_p8, %p891_p7 }
  0x41   :  { %652 = vmatprep.subr.bf16.mxu0 %v1027_v8  ;;  %674 = vmatprep.subr.bf16.mxu1 %v1027_v8 }
  0x42   :  { %240 = vmatprep.mubr.bf16.mxu0 %v111_v20  ;;  %p894_p10 = pnand %p893_p9, %p887_p6 }
  0x44   :  { %653 = vmatpush3.bf16.msra.mxu0 %v1031_v9  ;;  %675 = vmatpush3.bf16.msra.mxu1 %v1031_v9 }
  0x45   :  { %654 = vmatprep.subr.bf16.mxu0 %v1035_v10  ;;  %676 = vmatprep.subr.bf16.mxu1 %v1035_v10 }
  0x48   :  { %655 = vmatpush3.bf16.msra.mxu0 %v1043_v13  ;;  %677 = vmatpush3.bf16.msra.mxu1 %v1043_v13 }
  0x49   :  { %656 = vmatprep.subr.bf16.mxu0 %v1047_v15  ;;  %678 = vmatprep.subr.bf16.mxu1 %v1047_v15 }
  0x4c   :  { %657 = vmatpush3.bf16.msra.mxu0 %v1051_v17  ;;  %679 = vmatpush3.bf16.msra.mxu1 %v1051_v17 }
  0x4d   :  { %658 = vmatprep.subr.bf16.mxu0 %v1055_v19  ;;  %680 = vmatprep.subr.bf16.mxu1 %v1055_v19 }
  0x50   :  { %659 = vmatpush3.bf16.msra.mxu0 %v1059_v21  ;;  %681 = vmatpush3.bf16.msra.mxu1 %v1059_v21 }
  0x51   :  { %688 = vmatprep.subr.bf16.mxu0 %v998_v0  ;;  %710 = vmatprep.subr.bf16.mxu1 %v998_v0 }
  0x53   :  { %241 = vmatmul.mubr.bf16.vlgmr.msra.gmra.mxu0 %v108_v14 }
  0x54   :  { %689 = vmatpush3.bf16.msra.mxu0 %v1000_v1 }
  0x55   :  { %690 = vmatprep.subr.bf16.mxu0 %v1003_v2 }
  0x58   :  { %691 = vmatpush3.bf16.msra.mxu0 %v1007_v3 }
  0x59   :  { %692 = vmatprep.subr.bf16.mxu0 %v1011_v4 }
  0x5c   :  { %693 = vmatpush3.bf16.msra.mxu0 %v1015_v5 }
  0x5d   :  { %694 = vmatprep.subr.bf16.mxu0 %v1019_v6 }
  0x60   :  { %695 = vmatpush3.bf16.msra.mxu0 %v1023_v7 }
  0x61   :  { %696 = vmatprep.subr.bf16.mxu0 %v1027_v8 }
  0x64   :  { %697 = vmatpush3.bf16.msra.mxu0 %v1031_v9 }
  0x65   :  { %698 = vmatprep.subr.bf16.mxu0 %v1035_v10 }
  0x68   :  { %699 = vmatpush3.bf16.msra.mxu0 %v1043_v13 }
  0x69   :  { %700 = vmatprep.subr.bf16.mxu0 %v1047_v15 }
  0x6c   :  { %701 = vmatpush3.bf16.msra.mxu0 %v1051_v17 }
  0x6d   :  { %702 = vmatprep.subr.bf16.mxu0 %v1055_v19 }
  0x70   :  { %703 = vmatpush3.bf16.msra.mxu0 %v1059_v21 }
  0x71   :  { %732 = vmatprep.subr.bf16.mxu0 %v998_v0 }
 0x113   :  { %v660_v22 = vpop.f32.mrf.mxu0 }
 0x115   :  { %v661_v23 = vpop.f32.mrf.mxu0 }
 0x116   :  { %v1084_v24 = vadd.f32 %v661_v23, %v660_v22 }
 0x117   :  { %v663_v25 = vpop.f32.mrf.mxu0 }
 0x118   :  { %v248_v26 = vmax.f32 %v1084_v24, 1e-14 }
 0x119   :  { %v664_v27 = vpop.f32.mrf.mxu0 }
 0x11a   :  { %784 = vrsqrt.f32 %v248_v26 }
 0x127   :  { %v785_v28 = vpop.eup %784 }
 0x128   :  { %v250_v29 = vmul.f32 %v785_v28, %v248_v26 }
 0x12a   :  { %v632_v30 = vclamps-f32 %v250_v29, 0.99999 }
 0x12c   :  { %v253_v31 = vadd.f32 1.0, %v632_v30  ;;  %v256_v32 = vsub.f32 1.0, %v632_v30 }
 0x12e   :  { %786 = vlog2.f32 %v253_v31 }
 0x12f   :  { %788 = vlog2.f32 %v256_v32 }
 0x13b   :  { %v787_v33 = vpop.eup %786 }
 0x13c   :  { %v789_v34 = vpop.eup %788  ;;  %v255_v35 = vmul.f32 0.6931472, %v787_v33 }
 0x13d   :  { %v258_v36 = vmul.f32 0.6931472, %v789_v34 }
 0x13f   :  { %v259_v37 = vsub.f32 %v255_v35, %v258_v36 }
 0x141   :  { %v260_v38 = vmul.f32 0.5, %v259_v37 }
 0x143   :  { %v261_v39 = vmul.f32 %v785_v28, %v260_v38 }
 0x145   :  { %v262_v40 = vmul.f32 %v261_v39, %v1037_v11  ;;  %v388_v39 = vsub.f32 0.0, %v1037_v11 }
 0x147   :  { %271 = vrot.lane.b32.xlu0 %v262_v40, %s942_s2  ;;  %v270_v46 = vmul.f32 %v633_v42, %v262_v40 }
 0x14b   :  { %279 = vrot.lane.b32.xlu0 %v262_v40, %s943_s4 }
 0x1b9   :  { %v272_v43 = vpop.permute.xlu0 %271 }
 0x1ba   :  { %v277_v44 = vmul.f32 %v634_v41, %v272_v43 }
 0x1bc   :  { %v278_v48 = vadd.f32 %v277_v44, %v270_v46 }
 0x1bd   :  { %v280_v47 = vpop.permute.xlu0 %279 }
 0x1be   :  { %v285_v49 = vmul.f32 %v635_v45, %v280_v47 }
 0x1c0   :  { %v286_v50 = vadd.f32 %v285_v49, %v278_v48 }
 0x1c2   :  { %295 = vrot.lane.b32.xlu1 %v286_v50, %s944_s19  ;;  %v294_v56 = vmul.f32 %v636_v52, %v286_v50 }
 0x1c6   :  { %303 = vrot.lane.b32.xlu1 %v286_v50, %s945_s20 }
 0x234   :  { %v296_v53 = vpop.permute.xlu1 %295 }
 0x235   :  { %v301_v54 = vmul.f32 %v637_v51, %v296_v53 }
 0x237   :  { %v302_v58 = vadd.f32 %v301_v54, %v294_v56 }
 0x238   :  { %v304_v57 = vpop.permute.xlu1 %303 }
 0x239   :  { %v309_v59 = vmul.f32 %v638_v55, %v304_v57 }
 0x23b   :  { %v310_v60 = vadd.f32 %v309_v59, %v302_v58 }
 0x23d   :  { %327 = vrot.lane.b32.xlu1 %v310_v60, %s941_s14  ;;  %319 = vrot.lane.b32.xlu0 %v310_v60, %s946_s23  ;;  %v318_v14 = vmul.f32 %v639_v61, %v310_v60 }
 0x2af   :  { %v328_v0 = vpop.permute.xlu1 %327  ;;  %v320_v12 = vpop.permute.xlu0 %319 }
 0x2b0   :  { %v325_v16 = vmul.f32 %v640_v62, %v320_v12  ;;  %v333_v18 = vmul.f32 %v641_v63, %v328_v0 }
 0x2b2   :  { %v326_v20 = vadd.f32 %v325_v16, %v318_v14 }
 0x2b4   :  { %v334_v22 = vadd.f32 %v333_v18, %v326_v20 }
 0x2b6   :  { %v335_v23 = vmul.f32 %v334_v22, %v334_v22 }
 0x2b8   :  { %v336_v25 = vpack.c.bf16 %v335_v23, %v335_v23 }
 0x2ba   :  { %v337_v26 = vunpack.c.l.bf16 %v336_v25 }
 0x2bc   :  { %v338_v27 = vsub.f32 %v335_v23, %v337_v26 }
 0x2be   :  { %v339_v28 = vpack.c.bf16 %v338_v27, %v338_v27 }
 0x2c0   :  { %372 = vmatprep.mubr.bf16.mxu1 %v339_v28 }
 0x2c1   :  { %373 = vmatmul.mubr.bf16.vlgmr.msra.gmra.mxu1 %v336_v25 }
 0x2c2   :  { %711 = vmatpush3.bf16.msra.mxu1 %v1000_v1 }
 0x2c3   :  { %712 = vmatprep.subr.bf16.mxu1 %v1003_v2 }
 0x2c6   :  { %713 = vmatpush3.bf16.msra.mxu1 %v1007_v3 }
 0x2c7   :  { %714 = vmatprep.subr.bf16.mxu1 %v1011_v4 }
 0x2ca   :  { %715 = vmatpush3.bf16.msra.mxu1 %v1015_v5 }
 0x2cb   :  { %716 = vmatprep.subr.bf16.mxu1 %v1019_v6 }
 0x2ce   :  { %717 = vmatpush3.bf16.msra.mxu1 %v1023_v7 }
 0x2cf   :  { %718 = vmatprep.subr.bf16.mxu1 %v1027_v8 }
 0x2d2   :  { %719 = vmatpush3.bf16.msra.mxu1 %v1031_v9 }
 0x2d3   :  { %720 = vmatprep.subr.bf16.mxu1 %v1035_v10 }
 0x2d6   :  { %721 = vmatpush3.bf16.msra.mxu1 %v1043_v13 }
 0x2d7   :  { %722 = vmatprep.subr.bf16.mxu1 %v1047_v15 }
 0x2da   :  { %723 = vmatpush3.bf16.msra.mxu1 %v1051_v17 }
 0x2db   :  { %724 = vmatprep.subr.bf16.mxu1 %v1055_v19 }
 0x2de   :  { %725 = vmatpush3.bf16.msra.mxu1 %v1059_v21 }
 0x381   :  { %v682_v29 = vpop.f32.mrf.mxu1 }
 0x383   :  { %v683_v30 = vpop.f32.mrf.mxu1 }
 0x384   :  { %v684_v31 = vadd.f32 %v683_v30, %v682_v29 }
 0x385   :  { %v685_v32 = vpop.f32.mrf.mxu1 }
 0x386   :  { %v380_v33 = vmax.f32 %v684_v31, 1e-14 }
 0x387   :  { %v686_v34 = vpop.f32.mrf.mxu1 }
 0x388   :  { %790 = vrsqrt.f32 %v380_v33 }
 0x395   :  { %v791_v35 = vpop.eup %790 }
 0x396   :  { %v382_v36 = vmul.f32 %v791_v35, %v380_v33 }
 0x398   :  { %792 = vtanh.f32 %v382_v36 }
 0x3a5   :  { %v793_v37 = vpop.eup %792 }
 0x3a6   :  { %v384_v38 = vmul.f32 %v793_v37, %v791_v35 }
 0x3a8   :  { %v386_v40 = vmul.f32 %v384_v38, %v384_v38  ;;  %v385_v41 = vmul.f32 %v384_v38, %v334_v22 }
 0x3aa   :  { %v387_v42 = vmul.f32 %v684_v31, %v386_v40  ;;  %v389_v43 = vmul.f32 %v388_v39, %v385_v41 }
 0x3ac   :  { %v390_v44 = vpack.c.bf16 %v389_v43, %v389_v43 }
 0x3ae   :  { %v391_v45 = vunpack.c.l.bf16 %v390_v44 }
 0x3b0   :  { %v392_v46 = vsub.f32 %v389_v43, %v391_v45 }
 0x3b2   :  { %v393_v47 = vpack.c.bf16 %v392_v46, %v392_v46 }
 0x3b4   :  { %426 = vmatprep.mubr.bf16.mxu0 %v393_v47 }
 0x3b5   :  { %427 = vmatmul.mubr.bf16.vlgmr.msra.gmra.mxu0 %v390_v44 }
 0x3b6   :  { %733 = vmatpush3.bf16.msra.mxu0 %v1000_v1 }
 0x3b7   :  { %734 = vmatprep.subr.bf16.mxu0 %v1003_v2 }
 0x3ba   :  { %735 = vmatpush3.bf16.msra.mxu0 %v1007_v3 }
 0x3bb   :  { %736 = vmatprep.subr.bf16.mxu0 %v1011_v4 }
 0x3be   :  { %737 = vmatpush3.bf16.msra.mxu0 %v1015_v5 }
 0x3bf   :  { %738 = vmatprep.subr.bf16.mxu0 %v1019_v6 }
 0x3c2   :  { %739 = vmatpush3.bf16.msra.mxu0 %v1023_v7  ;;  %v441_v7 = vmul.f32 %v1084_v24, %v387_v42 }
 0x3c3   :  { %740 = vmatprep.subr.bf16.mxu0 %v1027_v8 }
 0x3c6   :  { %741 = vmatpush3.bf16.msra.mxu0 %v1031_v9  ;;  %v438_v9 = vsub.f32 1.0, %v1084_v24 }
 0x3c7   :  { %742 = vmatprep.subr.bf16.mxu0 %v1035_v10 }
 0x3ca   :  { %743 = vmatpush3.bf16.msra.mxu0 %v1043_v13 }
 0x3cb   :  { %744 = vmatprep.subr.bf16.mxu0 %v1047_v15 }
 0x3ce   :  { %745 = vmatpush3.bf16.msra.mxu0 %v1051_v17  ;;  %v439_v17 = vmul.f32 %v438_v9, %v385_v41 }
 0x3cf   :  { %746 = vmatprep.subr.bf16.mxu0 %v1055_v19 }
 0x3d2   :  { %747 = vmatpush3.bf16.msra.mxu0 %v1059_v21 }
 0x475   :  { %v704_v1 = vpop.f32.mrf.mxu0 }
 0x477   :  { %v705_v2 = vpop.f32.mrf.mxu0 }
 0x478   :  { %v706_v3 = vadd.f32 %v705_v2, %v704_v1 }
 0x479   :  { %v707_v4 = vpop.f32.mrf.mxu0 }
 0x47a   :  { %v434_v5 = vmul.f32 2.0, %v706_v3 }
 0x47b   :  { %v708_v6 = vpop.f32.mrf.mxu0 }
 0x47c   :  { %v435_v8 = vadd.f32 1.0, %v434_v5 }
 0x47e   :  { %v436_v10 = vadd.f32 %v435_v8, %v387_v42  ;;  %v442_v13 = vadd.f32 %v441_v7, %v435_v8 }
 0x480   :  { %v437_v15 = vmul.f32 %v436_v10, %v388_v39  ;;  %v443_v19 = vmax.f32 %v442_v13, 1e-07 }
 0x482   :  { %v440_v48 = vadd.f32 %v439_v17, %v437_v15  ;;  %794 = vrcp.f32 %v443_v19  ;;  %v947_v15 = vmov 0.0  }
 0x48f   :  { %v795_v21 = vpop.eup %794 }
 0x490   :  { %v445_v49 = vmul.f32 %v795_v21, %v443_v19 }
 0x492   :  { %v446_v50 = vsub.f32 2.0, %v445_v49 }
 0x494   :  { %v447_v51 = vmul.f32 %v795_v21, %v446_v50 }
 0x496   :  { %v448_v52 = vmul.f32 %v447_v51, %v440_v48 }
 0x498   :  { %v449_v53 = vmul.f32 %v448_v52, %v448_v52 }
 0x49a   :  { %v450_v54 = vpack.c.bf16 %v449_v53, %v449_v53 }
 0x49c   :  { %v451_v55 = vunpack.c.l.bf16 %v450_v54 }
 0x49e   :  { %v452_v56 = vsub.f32 %v449_v53, %v451_v55 }
 0x4a0   :  { %v453_v57 = vpack.c.bf16 %v452_v56, %v452_v56 }
 0x4a2   :  { %486 = vmatprep.mubr.bf16.mxu1 %v453_v57 }
 0x4a3   :  { %487 = vmatmul.mubr.bf16.vlgmr.msra.gmra.mxu1 %v450_v54 }
 0x563   :  { %v726_v58 = vpop.f32.mrf.mxu1 }
 0x565   :  { %v727_v59 = vpop.f32.mrf.mxu1 }
 0x566   :  { %v728_v60 = vadd.f32 %v727_v59, %v726_v58 }
 0x567   :  { %v729_v61 = vpop.f32.mrf.mxu1 }
 0x568   :  { %v494_v62 = vmax.f32 %v728_v60, 1e-14 }
 0x569   :  { %v730_v63 = vpop.f32.mrf.mxu1 }
 0x56a   :  { %796 = vrsqrt.f32 %v494_v62 }
 0x577   :  { %v797_v0 = vpop.eup %796 }
 0x578   :  { %v496_v12 = vmul.f32 %v797_v0, %v494_v62 }
 0x57a   :  { %v642_v14 = vclamps-f32 %v496_v12, 0.99999 }
 0x57c   :  { %v499_v16 = vadd.f32 1.0, %v642_v14  ;;  %v502_v18 = vsub.f32 1.0, %v642_v14 }
 0x57e   :  { %798 = vlog2.f32 %v499_v16 }
 0x57f   :  { %800 = vlog2.f32 %v502_v18 }
 0x58b   :  { %v799_v20 = vpop.eup %798 }
 0x58c   :  { %v801_v22 = vpop.eup %800  ;;  %v501_v23 = vmul.f32 0.6931472, %v799_v20 }
 0x58d   :  { %v504_v25 = vmul.f32 0.6931472, %v801_v22 }
 0x58f   :  { %v505_v26 = vsub.f32 %v501_v23, %v504_v25 }
 0x591   :  { %v506_v27 = vmul.f32 0.5, %v505_v26 }
 0x593   :  { %v507_v28 = vmul.f32 0.5, %v506_v27 }
 0x595   :  { %802 = vtanh.f32 %v507_v28 }
 0x5a2   :  { %v803_v29 = vpop.eup %802 }
 0x5a3   :  { %v509_v30 = vmul.f32 %v803_v29, %v797_v0 }
 0x5a5   :  { %v511_v31 = vmul.f32 %v509_v30, %v509_v30  ;;  %v510_v32 = vmul.f32 %v509_v30, %v448_v52 }
 0x5a7   :  { %v512_v33 = vmul.f32 %v728_v60, %v511_v31  ;;  %v513_v34 = vmul.f32 %v510_v32, %v1037_v11  ;;  %v562_v4 = vmul.f32 %v510_v32, %v438_v9 }
 0x5a9   :  { %v514_v35 = vpack.c.bf16 %v513_v34, %v513_v34  ;;  %v564_v45 = vmul.f32 %v1084_v24, %v512_v33 }
 0x5ab   :  { %v515_v36 = vunpack.c.l.bf16 %v514_v35 }
 0x5ad   :  { %v516_v37 = vsub.f32 %v513_v34, %v515_v36 }
 0x5af   :  { %v517_v38 = vpack.c.bf16 %v516_v37, %v516_v37 }
 0x5b1   :  { %550 = vmatprep.mubr.bf16.mxu0 %v517_v38 }
 0x5b2   :  { %551 = vmatmul.mubr.bf16.vlgmr.msra.gmra.mxu0 %v514_v35 }
 0x672   :  { %v748_v39 = vpop.f32.mrf.mxu0 }
 0x674   :  { %v749_v40 = vpop.f32.mrf.mxu0 }
 0x675   :  { %v750_v41 = vadd.f32 %v749_v40, %v748_v39 }
 0x676   :  { %v751_v42 = vpop.f32.mrf.mxu0 }
 0x677   :  { %v558_v43 = vmul.f32 2.0, %v750_v41 }
 0x678   :  { %v752_v44 = vpop.f32.mrf.mxu0 }
 0x679   :  { %v559_v46 = vadd.f32 1.0, %v558_v43 }
 0x67b   :  { %v560_v47 = vadd.f32 %v559_v46, %v512_v33  ;;  %v565_v1 = vadd.f32 %v564_v45, %v559_v46 }
 0x67d   :  { %v561_v2 = vmul.f32 %v560_v47, %v1037_v11  ;;  %v566_v3 = vmax.f32 %v565_v1, 1e-07 }
 0x67f   :  { %804 = vrcp.f32 %v566_v3  ;;  %v563_v5 = vadd.f32 %v562_v4, %v561_v2 }
 0x68c   :  { %v805_v6 = vpop.eup %804 }
 0x68d   :  { %v568_v7 = vmul.f32 %v805_v6, %v566_v3 }
 0x68f   :  { %v569_v8 = vsub.f32 2.0, %v568_v7 }
 0x691   :  { %v570_v10 = vmul.f32 %v805_v6, %v569_v8 }
 0x693   :  { %v571_v13 = vmul.f32 %v570_v10, %v563_v5 }
 0x695   :  { %vm573_vm0 = vcmp.ne.f32.partialorder %v571_v13, %v571_v13  ;;  %572 = vst [vmem:[#allocation10] sm:$0xff] %v571_v13 }
 0x696   :  { %v643_v17 = vsel %vm573_vm0, 1.0, %v947_v15 }
 0x697   :  { %576 = vmax.xlane.f32.xlu0 %v643_v17 }
 0x698   :  { %897 = shalt.err (!%p894_p10)
}
 0x699   :  { %594 = dma.vmem_to_hbm [thread:$0]  %s592_s26, 128, %s1149_s5, [#allocation4]  }
 0x69a   :  { %s949_s30 = smov [#allocation11]  }
 0x69b   :  { %s601_s7 = sshll.u32 %s949_s30, 4  ;;  %s602_s7 = int_to_ptr.vmem [resolvable:$true] %s601_s7 }
 0x69c   :  { %s906_s8 = scalar_lea.vmem %s602_s7, 128  ;;  %p911_p12 = scmp.lt.s32.totalorder %s602_s7, %s602_s7 }
 0x69d   :  { %p907_p11 = scmp.ne.s32.totalorder %s602_s7, %s906_s8  ;;  %p912_p13 = scmp.lt.s32.totalorder %s906_s8, %s906_s8 }
 0x69f   :  { %p913_p0 = por %p912_p13, %p911_p12 }
 0x6a1   :  { %p914_p1 = pnand %p913_p0, %p907_p11 }
 0x720   :  { %v577_v11 = vpop.xlane.xlu0 %576 }
 0x721   :  { %v578_v24 = vrot.slane %v577_v11, 4 }
 0x723   :  { %v579_v9 = vmax.f32 %v577_v11, %v578_v24 }
 0x725   :  { %v580_v19 = vrot.slane %v579_v9, 2 }
 0x727   :  { %v581_v48 = vmax.f32 %v579_v9, %v580_v19 }
 0x729   :  { %v582_v21 = vrot.slane %v581_v48, 1 }
 0x72b   :  { %v583_v49 = vmax.f32 %v581_v48, %v582_v21 }
 0x72d   :  { %584 = vst [vmem:[#allocation11] sm:$0xff] %v583_v49 }
 0x72e   :  { %917 = shalt.err (!%p914_p1)
}
 0x72f   :  { %604 = dma.vmem_to_hbm [thread:$0]  %s602_s7, 128, %s1150_s6, [#allocation12]  }
 0x730   :  { %932 = dma.done.wait [#allocation4], 128  }
 0x731   :  { %933 = vsyncadd [#allocation4], 4294967168 }
 0x732   :  { %934 = dma.done.wait [#allocation12], 128  }
 0x733   :  { %935 = vsyncadd [#allocation12], 4294967168 }
 0x734   :  { %611 = vsyncpa [#allocation3], 1 }
 0x735   :  { %612 = vsyncpa [#allocation6], 1 }
 0x736   :  { %613 = vsyncpa [#allocation9], 1 }
 0x737   :  { %614 = vsyncpa [#allocation4], 1 }
 0x738   :  { %615 = vsyncpa [#allocation12], 1 }

</bundles_post_ra>
